<compile_context>
chip_gen: v7x
topology: tpu7x:2x2x1
jax: 0.10.0
libtpu: 0.0.40
codegen_flags: <defaults>
</compile_context>

<pallas_src>
import functools

import jax
import jax.numpy as jnp
from jax import lax
from jax.experimental import pallas as pl
from jax.experimental.pallas import tpu as pltpu


# ---------------------------------------------------------------------------
# Pallas kernel: conv3x3(same) + bias + ReLU + global-avg-pool + linear,
# for ALL images (both Siamese branches) in one shot, transposed/lane-dense.
# ---------------------------------------------------------------------------
def _siamese_embed_kernel(pat_ref, wct_ref, bct_ref, wl_ref, bl_ref, out_ref,
                          *, N, HW):
    # Fused im2col conv: (COUT, K) @ (K, N*H*W) -> (COUT, N*H*W), one MXU push
    # with the full K=9*C contraction, intermediate fully lane-dense.
    h = jnp.dot(wct_ref[...], pat_ref[...], preferred_element_type=jnp.float32)

    # Bias + ReLU on dense vregs (VPU); bias broadcasts along lanes.
    h = jnp.maximum(h + bct_ref[...], 0.0)

    # Global average pool (1/(H*W) already folded into wl): per-image segment
    # sums over 256-lane-aligned static slices -> (COUT, N).  XLU reduction.
    cols = [jnp.sum(h[:, i * HW:(i + 1) * HW], axis=1, keepdims=True)
            for i in range(N)]
    pooled = jnp.concatenate(cols, axis=1)                     # (COUT, N)

    # Final linear: contract the COUT axis of pooled (transposed-LHS matmul)
    # against the lane-padded weight -> (N, EPAD) lane-dense output.
    emb = lax.dot_general(pooled, wl_ref[...],
                          (((0,), (0,)), ((), ())),
                          preferred_element_type=jnp.float32)
    out_ref[...] = (emb + bl_ref[...]).astype(out_ref.dtype)


# ---------------------------------------------------------------------------
# Wrapper: single pallas_call for an (N, C, H, W) stack of images -> (N, E)
# ---------------------------------------------------------------------------
def _embed_pallas(x_nchw, params):
    wc, bc, wl, bl = params
    N, C, H, W = x_nchw.shape
    COUT = wc.shape[1]
    E = wl.shape[1]
    EPAD = ((E + 127) // 128) * 128
    K = 9 * C
    HW = H * W
    M = N * HW

    # One-time lane-dense im2col prep (fuses under jit).  patches[k, m] with
    #   k = c*9 + ky*3 + kx   (matches the (Cin*9, Cout) conv-weight layout)
    #   m = n*H*W + h*W + w   (per-image segments are 128-lane aligned, HW=256)
    # TODO(synk): for large N*H*W, do the halo/im2col inside the kernel so the
    # 9x-expanded patch matrix never materializes in HBM.
    x = x_nchw.astype(jnp.float32)
    xp = jnp.pad(x, ((0, 0), (0, 0), (1, 1), (1, 1)))
    taps = [xp[:, :, ky:ky + H, kx:kx + W] for ky in range(3) for kx in range(3)]
    pat = jnp.stack(taps, axis=2)                              # (N, C, 9, H, W)
    pat = pat.reshape(N, K, HW).transpose(1, 0, 2).reshape(K, M)

    wct = wc.astype(jnp.float32).T                             # (COUT, K)
    bct = bc.astype(jnp.float32).reshape(COUT, 1)              # (COUT, 1)
    # Fold GAP's 1/(H*W) into the linear weight; lane-pad the embedding dim.
    wl_p = jnp.pad(wl.astype(jnp.float32) / HW, ((0, 0), (0, EPAD - E)))
    bl_p = jnp.pad(bl.astype(jnp.float32).reshape(1, E), ((0, 0), (0, EPAD - E)))

    kernel = functools.partial(_siamese_embed_kernel, N=N, HW=HW)

    out = pl.pallas_call(
        kernel,
        out_shape=jax.ShapeDtypeStruct((N, EPAD), jnp.float32),
        grid=(1,),
        in_specs=[
            pl.BlockSpec((K, M), lambda i: (0, 0)),        # patches, lane-dense
            pl.BlockSpec((COUT, K), lambda i: (0, 0)),     # conv weight (flat)
            pl.BlockSpec((COUT, 1), lambda i: (0, 0)),     # conv bias
            pl.BlockSpec((COUT, EPAD), lambda i: (0, 0)),  # linear weight (/HW)
            pl.BlockSpec((1, EPAD), lambda i: (0, 0)),     # linear bias
        ],
        out_specs=pl.BlockSpec((N, EPAD), lambda i: (0, 0)),
        compiler_params=pltpu.CompilerParams(
            dimension_semantics=("arbitrary",)),
    )(pat, wct, bct, wl_p, bl_p)

    return out[:, :E]


@jax.jit
def siamese_forward(x1, x2, params):
    """SiameseNet.forward: shared-weight embedding of both inputs, one kernel."""
    B = x1.shape[0]
    emb = _embed_pallas(jnp.concatenate([x1, x2], axis=0), params)
    return emb[:B], emb[B:]


@jax.jit
def get_embedding(x, params):
    """SiameseNet.get_embedding."""
    return _embed_pallas(x, params)


# ---------------------------------------------------------------------------
# Pure-JAX reference of the same embedding net (correctness check)
# ---------------------------------------------------------------------------
def embed_reference(x_nchw, params):
    wc, bc, wl, bl = params
    Cout = wc.shape[1]
    Cin = x_nchw.shape[1]
    # wc is (Cin*9, Cout) with row index = cin*9 + ky*3 + kx  ->  OIHW weights
    w_oihw = wc.T.reshape(Cout, Cin, 3, 3)
    y = lax.conv_general_dilated(
        x_nchw.astype(jnp.float32), w_oihw,
        window_strides=(1, 1), padding=((1, 1), (1, 1)),
        dimension_numbers=("NCHW", "OIHW", "NCHW"))
    y = jnp.maximum(y + bc.reshape(1, Cout, 1, 1), 0.0)
    pooled = jnp.mean(y, axis=(2, 3))                          # (B, Cout)
    return pooled @ wl + bl


# ---------------------------------------------------------------------------
# Deterministic parameter init (synthetic, no checkpoint)
# ---------------------------------------------------------------------------
def init_params(key, cin=4, cout=8, emb=32):
    k1, k2, k3, k4 = jax.random.split(key, 4)
    wc = jax.random.normal(k1, (cin * 9, cout), jnp.float32) * 0.1  # conv weight (im2col layout)
    bc = jax.random.normal(k2, (1, cout), jnp.float32) * 0.1        # conv bias
    wl = jax.random.normal(k3, (cout, emb), jnp.float32) * 0.1      # linear weight
    bl = jax.random.normal(k4, (1, emb), jnp.float32) * 0.1         # linear bias
    return wc, bc, wl, bl


if __name__ == "__main__":
    B, C, H, W = 2, 4, 16, 16
    key = jax.random.PRNGKey(0)
    k1, k2, kp = jax.random.split(key, 3)
    x1 = jax.random.normal(k1, (B, C, H, W), jnp.float32)
    x2 = jax.random.normal(k2, (B, C, H, W), jnp.float32)

    params = init_params(kp, cin=C, cout=8, emb=32)

    out1, out2 = siamese_forward(x1, x2, params)
    out1 = jax.block_until_ready(out1)
    out2 = jax.block_until_ready(out2)
    emb1 = jax.block_until_ready(get_embedding(x1, params))

    # Check against the pure-JAX reference of the same embedding net.
    ref1 = embed_reference(x1, params)
    ref2 = embed_reference(x2, params)
    assert out1.shape == (B, 32) and out2.shape == (B, 32)
    assert jnp.allclose(out1, ref1, atol=1e-3, rtol=1e-3)
    assert jnp.allclose(out2, ref2, atol=1e-3, rtol=1e-3)
    assert jnp.allclose(emb1, ref1, atol=1e-3, rtol=1e-3)

    print("KERNEL_OK")
</pallas_src>

<mosaic_0001>
module attributes {stable_mosaic.version = 11 : i64} {
  func.func @_siamese_embed_kernel(%arg0: i32, %arg1: memref<36x1024xf32, #tpu.memory_space<vmem>>, %arg2: memref<8x36xf32, #tpu.memory_space<vmem>>, %arg3: memref<8x1xf32, #tpu.memory_space<vmem>>, %arg4: memref<8x128xf32, #tpu.memory_space<vmem>>, %arg5: memref<1x128xf32, #tpu.memory_space<vmem>>, %arg6: memref<4x128xf32, #tpu.memory_space<vmem>>) attributes {dimension_semantics = [#tpu.dimension_semantics<arbitrary>], iteration_bounds = array<i64: 1>, scalar_prefetch = 0 : i64, scratch_operands = 0 : i64, tpu.core_type = #tpu.core_type<tc>, window_params = [{pipeline_mode = #tpu.pipeline_mode<synchronous>, transform_indices = @transform_0, window_bounds = array<i64: 36, 1024>}, {pipeline_mode = #tpu.pipeline_mode<synchronous>, transform_indices = @transform_1, window_bounds = array<i64: 8, 36>}, {pipeline_mode = #tpu.pipeline_mode<synchronous>, transform_indices = @transform_2, window_bounds = array<i64: 8, 1>}, {pipeline_mode = #tpu.pipeline_mode<synchronous>, transform_indices = @transform_3, window_bounds = array<i64: 8, 128>}, {pipeline_mode = #tpu.pipeline_mode<synchronous>, transform_indices = @transform_4, window_bounds = array<i64: 1, 128>}, {pipeline_mode = #tpu.pipeline_mode<synchronous>, transform_indices = @transform_5, window_bounds = array<i64: 4, 128>}]} {
    %c0 = arith.constant 0 : index
    %c0_0 = arith.constant 0 : index
    %0 = vector.load %arg2[%c0, %c0_0] : memref<8x36xf32, #tpu.memory_space<vmem>>, vector<8x36xf32>
    %c0_1 = arith.constant 0 : index
    %c0_2 = arith.constant 0 : index
    %1 = vector.load %arg1[%c0_1, %c0_2] : memref<36x1024xf32, #tpu.memory_space<vmem>>, vector<36x1024xf32>
    %cst = arith.constant dense<0.000000e+00> : vector<8x1024xf32>
    %2 = tpu.matmul %0, %1, %cst {dimension_numbers = #tpu.dot_dimension_numbers<[1], [0], [0], [1], [0, 0, 1, 1], [], []>} : vector<8x36xf32>, vector<36x1024xf32>, vector<8x1024xf32> -> vector<8x1024xf32>
    %c0_3 = arith.constant 0 : index
    %c0_4 = arith.constant 0 : index
    %3 = vector.load %arg3[%c0_3, %c0_4] : memref<8x1xf32, #tpu.memory_space<vmem>>, vector<8x1xf32>
    %4 = vector.broadcast %3 : vector<8x1xf32> to vector<8x1024xf32>
    %5 = arith.addf %2, %4 : vector<8x1024xf32>
    %cst_5 = arith.constant 0.000000e+00 : f32
    %6 = vector.broadcast %cst_5 : f32 to vector<8x1024xf32>
    %7 = arith.maximumf %5, %6 : vector<8x1024xf32>
    %8 = vector.extract_strided_slice %7 {offsets = [0, 0], sizes = [8, 256], strides = [1, 1]} : vector<8x1024xf32> to vector<8x256xf32>
    %cst_6 = arith.constant dense<0.000000e+00> : vector<8xf32>
    %9 = vector.multi_reduction <add>, %8, %cst_6 [1] : vector<8x256xf32> to vector<8xf32>
    %10 = vector.shape_cast %9 : vector<8xf32> to vector<8x1xf32>
    %11 = vector.extract_strided_slice %7 {offsets = [0, 256], sizes = [8, 256], strides = [1, 1]} : vector<8x1024xf32> to vector<8x256xf32>
    %cst_7 = arith.constant dense<0.000000e+00> : vector<8xf32>
    %12 = vector.multi_reduction <add>, %11, %cst_7 [1] : vector<8x256xf32> to vector<8xf32>
    %13 = vector.shape_cast %12 : vector<8xf32> to vector<8x1xf32>
    %14 = vector.extract_strided_slice %7 {offsets = [0, 512], sizes = [8, 256], strides = [1, 1]} : vector<8x1024xf32> to vector<8x256xf32>
    %cst_8 = arith.constant dense<0.000000e+00> : vector<8xf32>
    %15 = vector.multi_reduction <add>, %14, %cst_8 [1] : vector<8x256xf32> to vector<8xf32>
    %16 = vector.shape_cast %15 : vector<8xf32> to vector<8x1xf32>
    %17 = vector.extract_strided_slice %7 {offsets = [0, 768], sizes = [8, 256], strides = [1, 1]} : vector<8x1024xf32> to vector<8x256xf32>
    %cst_9 = arith.constant dense<0.000000e+00> : vector<8xf32>
    %18 = vector.multi_reduction <add>, %17, %cst_9 [1] : vector<8x256xf32> to vector<8xf32>
    %19 = vector.shape_cast %18 : vector<8xf32> to vector<8x1xf32>
    %20 = tpu.concatenate %10, %13, %16, %19 in 1 : vector<8x1xf32>, vector<8x1xf32>, vector<8x1xf32>, vector<8x1xf32> -> vector<8x4xf32>
    %c0_10 = arith.constant 0 : index
    %c0_11 = arith.constant 0 : index
    %21 = vector.load %arg4[%c0_10, %c0_11] : memref<8x128xf32, #tpu.memory_space<vmem>>, vector<8x128xf32>
    %cst_12 = arith.constant dense<0.000000e+00> : vector<4x128xf32>
    %22 = tpu.matmul %20, %21, %cst_12 {dimension_numbers = #tpu.dot_dimension_numbers<[0], [0], [1], [1], [0, 1, 1, 1], [], []>} : vector<8x4xf32>, vector<8x128xf32>, vector<4x128xf32> -> vector<4x128xf32>
    %c0_13 = arith.constant 0 : index
    %c0_14 = arith.constant 0 : index
    %23 = vector.load %arg5[%c0_13, %c0_14] : memref<1x128xf32, #tpu.memory_space<vmem>>, vector<1x128xf32>
    %24 = vector.broadcast %23 : vector<1x128xf32> to vector<4x128xf32>
    %25 = arith.addf %22, %24 : vector<4x128xf32>
    %c0_15 = arith.constant 0 : index
    %c0_16 = arith.constant 0 : index
    %26 = vector.load %arg6[%c0_15, %c0_16] : memref<4x128xf32, #tpu.memory_space<vmem>>, vector<4x128xf32>
    tpu.vector_store %arg6[%c0_15, %c0_16], %25 {strides = array<i32>} : memref<4x128xf32, #tpu.memory_space<vmem>>, vector<4x128xf32>,
    return
  }
  func.func @transform_0(%arg0: i32) -> (i32, i32) {
    %c0_i32 = arith.constant 0 : i32
    %c0_i32_0 = arith.constant 0 : i32
    %c0_i32_1 = arith.constant 0 : i32
    return %c0_i32, %c0_i32_0 : i32, i32
  }
  func.func @transform_1(%arg0: i32) -> (i32, i32) {
    %c0_i32 = arith.constant 0 : i32
    %c0_i32_0 = arith.constant 0 : i32
    %c0_i32_1 = arith.constant 0 : i32
    return %c0_i32, %c0_i32_0 : i32, i32
  }
  func.func @transform_2(%arg0: i32) -> (i32, i32) {
    %c0_i32 = arith.constant 0 : i32
    %c0_i32_0 = arith.constant 0 : i32
    %c0_i32_1 = arith.constant 0 : i32
    return %c0_i32, %c0_i32_0 : i32, i32
  }
  func.func @transform_3(%arg0: i32) -> (i32, i32) {
    %c0_i32 = arith.constant 0 : i32
    %c0_i32_0 = arith.constant 0 : i32
    %c0_i32_1 = arith.constant 0 : i32
    return %c0_i32, %c0_i32_0 : i32, i32
  }
  func.func @transform_4(%arg0: i32) -> (i32, i32) {
    %c0_i32 = arith.constant 0 : i32
    %c0_i32_0 = arith.constant 0 : i32
    %c0_i32_1 = arith.constant 0 : i32
    return %c0_i32, %c0_i32_0 : i32, i32
  }
  func.func @transform_5(%arg0: i32) -> (i32, i32) {
    %c0_i32 = arith.constant 0 : i32
    %c0_i32_0 = arith.constant 0 : i32
    %c0_i32_1 = arith.constant 0 : i32
    return %c0_i32, %c0_i32_0 : i32, i32
  }
}

</mosaic_0001>

<bundles_post_ra>
// kernel: siamese_forward.1
= control target key start
LH: loop header
LB: loop body
LE: loop exit
PB: predicated region body
PF: predicated region fallthrough
CT: control target
= control target key end

     0   :  { %v582_v3 = vmov 0.0   ;;  %v583_v8 = vmov 0   ;;  %vm71_vm0 = vcmask 1043456   ;;  %vm67_vm1 = vcmask 293888   ;;  %s768_s0 = inlined_call_operand.vmem [shape: f32[36,1024], index: 0, kind: input, shape index: {}]   ;;  %s769_s1 = inlined_call_operand.vmem [shape: f32[8,36], index: 1, kind: input, shape index: {}]   ;;  %s770_s2 = inlined_call_operand.vmem [shape: f32[8,1], index: 2, kind: input, shape index: {}]   ;;  %s771_s3 = inlined_call_operand.vmem [shape: f32[8,128], index: 3, kind: input, shape index: {}]   ;;  %s772_s4 = inlined_call_operand.vmem [shape: f32[1,128], index: 4, kind: input, shape index: {}]   ;;  %s773_s5 = inlined_call_operand.vmem [shape: f32[4,128], index: 5, kind: output, shape index: {}]  }
   0x1   :  { %v22_v0 = vld [vmem:[%s768_s0 + $0x8] sm:$0xff]  ;;  %v24_v2 = vld [vmem:[%s768_s0 + $0x18] sm:$0xff]  ;;  %160 = vmatprep.mubr.f32.mxu0 %v582_v3  ;;  %231 = vmatprep.mubr.f32.mxu1 %v582_v3  ;;  %v21_v6 = vld [vmem:[%s768_s0] sm:$0xff]  ;;  %vm584_vm2 = vmmov 0   ;;  %vm400_vm3 = vcmask 7168   ;;  %vm402_vm4 = vcmask 15360  }
   0x2   :  { %v30_v1 = vld [vmem:[%s768_s0 + $0x48] sm:$0xff]  ;;  %v32_v5 = vld [vmem:[%s768_s0 + $0x58] sm:$0xff]  ;;  %v29_v7 = vld [vmem:[%s768_s0 + $0x40] sm:$0xff]  ;;  %581 = vset.pattern.permute.xlu0 %v583_v8  ;;  %vm404_vm5 = vcmask 23552   ;;  %vm446_vm6 = vcmask 64512  }
   0x3   :  { %v546_v4 = vpack.c.bf16 %v30_v1, %v22_v0  ;;  %v554_v9 = vpack.c.bf16 %v32_v5, %v24_v2  ;;  %v548_v10 = vpack.c.bf16 %v29_v7, %v21_v6  ;;  %v23_v11 = vld [vmem:[%s768_s0 + $0x10] sm:$0xff]  ;;  %v38_v13 = vld [vmem:[%s768_s0 + $0x88] sm:$0xff]  ;;  %v40_v16 = vld [vmem:[%s768_s0 + $0x98] sm:$0xff] }
   0x4   :  { %v31_v12 = vld [vmem:[%s768_s0 + $0x50] sm:$0xff]  ;;  %v46_v15 = vld [vmem:[%s768_s0 + $0xc8] sm:$0xff]  ;;  %v48_v17 = vld [vmem:[%s768_s0 + $0xd8] sm:$0xff] }
   0x5   :  { %547 = vmatprep.subr.bf16.mxu0 %v546_v4  ;;  %v556_v14 = vpack.c.bf16 %v31_v12, %v23_v11  ;;  %555 = vmatprep.subr.bf16.mxu1 %v554_v9  ;;  %v550_v18 = vpack.c.bf16 %v46_v15, %v38_v13  ;;  %v558_v19 = vpack.c.bf16 %v48_v17, %v40_v16  ;;  %v37_v20 = vld [vmem:[%s768_s0 + $0x80] sm:$0xff]  ;;  %v39_v22 = vld [vmem:[%s768_s0 + $0x90] sm:$0xff]  ;;  %v54_v26 = vld [vmem:[%s768_s0 + $0x108] sm:$0xf] }
   0x6   :  { %549 = vmatpush1.bf16.msra.mxu0 %v548_v10  ;;  %v45_v21 = vld [vmem:[%s768_s0 + $0xc0] sm:$0xff]  ;;  %v47_v24 = vld [vmem:[%s768_s0 + $0xd0] sm:$0xff]  ;;  %v56_v27 = vld [vmem:[%s768_s0 + $0x118] sm:$0xf] }
   0x7   :  { %557 = vmatpush1.bf16.msra.mxu1 %v556_v14  ;;  %v552_v23 = vpack.c.bf16 %v45_v21, %v37_v20  ;;  %551 = vmatprep.subr.bf16.mxu0 %v550_v18  ;;  %v560_v25 = vpack.c.bf16 %v47_v24, %v39_v22  ;;  %v53_v28 = vld [vmem:[%s768_s0 + $0x100] sm:$0xf]  ;;  %v26_v29 = vld [vmem:[%s768_s0 + $0x28] sm:$0xff]  ;;  %v28_v31 = vld [vmem:[%s768_s0 + $0x38] sm:$0xff] }
   0x8   :  { %559 = vmatprep.subr.bf16.mxu1 %v558_v19  ;;  %v34_v30 = vld [vmem:[%s768_s0 + $0x68] sm:$0xff]  ;;  %v55_v32 = vld [vmem:[%s768_s0 + $0x110] sm:$0xf]  ;;  %v20_v33 = vld [vmem:[%s769_s1] sm:$0xff] }
   0x9   :  { %v36_v34 = vld [vmem:[%s768_s0 + $0x78] sm:$0xff]  ;;  %v25_v35 = vld [vmem:[%s768_s0 + $0x20] sm:$0xff]  ;;  %v27_v37 = vld [vmem:[%s768_s0 + $0x30] sm:$0xff]  ;;  %v562_v40 = vpack.c.bf16 %v34_v30, %v26_v29 }
   0xa   :  { %553 = vmatpush1.bf16.msra.mxu0 %v552_v23  ;;  %v33_v36 = vld [vmem:[%s768_s0 + $0x60] sm:$0xff]  ;;  %v35_v38 = vld [vmem:[%s768_s0 + $0x70] sm:$0xff]  ;;  %v42_v39 = vld [vmem:[%s768_s0 + $0xa8] sm:$0xff]  ;;  %v570_v44 = vpack.c.bf16 %v36_v34, %v28_v31 }
   0xb   :  { %561 = vmatpush1.bf16.msra.mxu1 %v560_v25  ;;  %525 = vmatprep.subr.msk.mxu0 %vm71_vm0, %v54_v26  ;;  %v50_v41 = vld [vmem:[%s768_s0 + $0xe8] sm:$0xff]  ;;  %v44_v42 = vld [vmem:[%s768_s0 + $0xb8] sm:$0xff]  ;;  %v564_v45 = vpack.c.bf16 %v33_v36, %v25_v35  ;;  %v572_v46 = vpack.c.bf16 %v35_v38, %v27_v37  ;;  %v41_v48 = vld [vmem:[%s768_s0 + $0xa0] sm:$0xff] }
   0xc   :  { %528 = vmatprep.subr.msk.mxu1 %vm71_vm0, %v56_v27  ;;  %v52_v43 = vld [vmem:[%s768_s0 + $0xf8] sm:$0xff]  ;;  %v566_v47 = vpack.c.bf16 %v50_v41, %v42_v39  ;;  %v49_v49 = vld [vmem:[%s768_s0 + $0xe0] sm:$0xff]  ;;  %v43_v51 = vld [vmem:[%s768_s0 + $0xb0] sm:$0xff] }
   0xd   :  { %v574_v50 = vpack.c.bf16 %v52_v43, %v44_v42  ;;  %v51_v52 = vld [vmem:[%s768_s0 + $0xf0] sm:$0xff]  ;;  %v568_v53 = vpack.c.bf16 %v49_v49, %v41_v48  ;;  %v61_v54 = vld [vmem:[%s770_s2] sm:$0xff]  ;;  %v58_v56 = vld [vmem:[%s768_s0 + $0x128] sm:$0xf] }
   0xe   :  { %526 = vmatpush1.msk.msra.mxu0 %vm71_vm0, %v53_v28  ;;  %v576_v55 = vpack.c.bf16 %v51_v52, %v43_v51  ;;  %v60_v57 = vld [vmem:[%s768_s0 + $0x138] sm:$0xf]  ;;  %64 = vperm.xlu0 %581, %v61_v54   ;;  %v57_v58 = vld [vmem:[%s768_s0 + $0x120] sm:$0xf]  ;;  %v59_v59 = vld [vmem:[%s768_s0 + $0x130] sm:$0xf] }
   0xf   :  { %529 = vmatpush1.msk.msra.mxu1 %vm71_vm0, %v55_v32  ;;  %527 = vmatmul.mubr.msk.f32.vlgmr.msra.gmra.mrb[0].mxu0 %vm67_vm1, %v20_v33  ;;  %v406_v26 = vld [vmem:[%s771_s3] sm:$0xff] }
  0x10   :  { %530 = vmatmul.mubr.msk.f32.vlgmr.msra.gmra.mrb[0].mxu1 %vm67_vm1, %v20_v33  ;;  %563 = vmatprep.subr.bf16.mxu0 %v562_v40  ;;  %v537_v35 = vld [vmem:[%s772_s4] ss:$0 sm:$0xff] }
  0x11   :  { %571 = vmatprep.subr.bf16.mxu1 %v570_v44  ;;  %565 = vmatpush1.bf16.msra.mxu0 %v564_v45 }
  0x12   :  { %573 = vmatpush1.bf16.msra.mxu1 %v572_v46  ;;  %567 = vmatprep.subr.bf16.mxu0 %v566_v47 }
  0x13   :  { %575 = vmatprep.subr.bf16.mxu1 %v574_v50  ;;  %302 = vmatprep.mubr.f32.mxu0 %v582_v3 }
  0x14   :  { %373 = vmatprep.mubr.f32.mxu1 %v582_v3 }
  0x15   :  { %569 = vmatpush1.bf16.msra.mxu0 %v568_v53 }
  0x16   :  { %577 = vmatpush1.bf16.msra.mxu1 %v576_v55  ;;  %531 = vmatprep.subr.msk.mxu0 %vm71_vm0, %v58_v56 }
  0x17   :  { %534 = vmatprep.subr.msk.mxu1 %vm71_vm0, %v60_v57 }
  0x19   :  { %532 = vmatpush1.msk.msra.mxu0 %vm71_vm0, %v57_v58 }
  0x1a   :  { %535 = vmatpush1.msk.msra.mxu1 %vm71_vm0, %v59_v59  ;;  %533 = vmatmul.mubr.msk.f32.vlgmr.msra.gmra.mrb[2].mxu0 %vm67_vm1, %v20_v33 }
  0x1b   :  { %536 = vmatmul.mubr.msk.f32.vlgmr.msra.gmra.mrb[2].mxu1 %vm67_vm1, %v20_v33  ;;  %541 = vmatprep.subr.mxu0 %v582_v3 }
  0x1c   :  { %543 = vmatprep.mubr.msk.f32.mxu0 %vm584_vm2, %v582_v3  ;;  %542 = vmatpush3.msra.mxu0 %v406_v26 }
  0x8d   :  { %v65_v60 = vpop.permute.xlu0 %64 }
  0xe2   :  { %v162_v61 = vpop.f32.mrb[0].mxu0 }
  0xe3   :  { %v233_v62 = vpop.f32.mrb[0].mxu1  ;;  %v164_v63 = vpop.f32.mrb[1].mxu0  ;;  %v163_v0 = vadd.f32 %v162_v61, %v65_v60 }
  0xe4   :  { %v165_v1 = vadd.f32 %v164_v63, %v65_v60  ;;  %v235_v2 = vpop.f32.mrb[1].mxu1  ;;  %v234_v4 = vadd.f32 %v233_v62, %v65_v60 }
  0xe5   :  { %v236_v5 = vadd.f32 %v235_v2, %v65_v60  ;;  %v380_v6 = vmax.f32 %v163_v0, 0.0 }
  0xe6   :  { %v381_v7 = vmax.f32 %v165_v1, 0.0  ;;  %v382_v8 = vmax.f32 %v234_v4, 0.0 }
  0xe7   :  { %v383_v9 = vmax.f32 %v236_v5, 0.0 }
  0xe8   :  { %v388_v10 = vadd.f32 %v381_v7, %v380_v6 }
  0xe9   :  { %v391_v11 = vadd.f32 %v383_v9, %v382_v8 }
  0xea   :  { %389 = vadd.xlane.f32.xlu0 %v388_v10 }
  0xeb   :  { %392 = vadd.xlane.f32.xlu1 %v391_v11 }
  0xed   :  { %v304_v12 = vpop.f32.mrb[2].mxu0 }
  0xee   :  { %v305_v13 = vadd.f32 %v304_v12, %v65_v60  ;;  %v375_v14 = vpop.f32.mrb[2].mxu1  ;;  %v306_v15 = vpop.f32.mrb[3].mxu0 }
  0xef   :  { %v376_v16 = vadd.f32 %v375_v14, %v65_v60  ;;  %v307_v17 = vadd.f32 %v306_v15, %v65_v60  ;;  %v377_v18 = vpop.f32.mrb[3].mxu1 }
  0xf0   :  { %v384_v19 = vmax.f32 %v305_v13, 0.0  ;;  %v378_v20 = vadd.f32 %v377_v18, %v65_v60 }
  0xf1   :  { %v386_v21 = vmax.f32 %v376_v16, 0.0  ;;  %v385_v22 = vmax.f32 %v307_v17, 0.0 }
  0xf2   :  { %v387_v23 = vmax.f32 %v378_v20, 0.0 }
  0xf3   :  { %v394_v24 = vadd.f32 %v385_v22, %v384_v19 }
  0xf4   :  { %v397_v25 = vadd.f32 %v387_v23, %v386_v21 }
  0xf5   :  { %395 = vadd.xlane.f32.xlu1 %v394_v24 }
  0xf9   :  { %398 = vadd.xlane.f32.xlu1 %v397_v25 }
 0x177   :  { %v390_v28 = vpop.xlane.xlu0 %389 }
 0x178   :  { %v393_v27 = vpop.xlane.xlu1 %392 }
 0x179   :  { %v401_v30 = vsel %vm400_vm3, %v390_v28, %v393_v27 }
 0x182   :  { %v396_v29 = vpop.xlane.xlu1 %395 }
 0x183   :  { %v403_v31 = vsel %vm402_vm4, %v401_v30, %v396_v29 }
 0x186   :  { %v399_v32 = vpop.xlane.xlu1 %398 }
 0x187   :  { %v405_v33 = vsel %vm404_vm5, %v403_v31, %v399_v32 }
 0x188   :  { %414 = vxpose.xlu1.b32.start.end [1/1] (short) (narrow) %v405_v33, 8 }
 0x208   :  { %v430_v34 = vpop.trf.xlu1 }
 0x209   :  { %544 = vmatmul.mubr.msk.f32.vlgmr.msra.gmra.mrb[4].mxu0 %vm446_vm6, %v430_v34 }
 0x2dc   :  { %v516_v3 = vpop.f32.mrb[4].mxu0 }
 0x2dd   :  { %v517_v36 = vadd.f32 %v537_v35, %v516_v3  ;;  %v545_v37 = vpop.f32.mrb[5].mxu0 }
 0x2df   :  { %520 = vst [vmem:[%s773_s5] sm:$0xf] %v517_v36 }

</bundles_post_ra>
